<compile_context>
chip_gen: v7x
topology: tpu7x:2x2x1
jax: 0.10.0
libtpu: 0.0.40
codegen_flags: <defaults>
</compile_context>

<pallas_src>
import functools

import jax
import jax.numpy as jnp
from jax.experimental import pallas as pl
from jax.experimental.pallas import tpu as pltpu

LANE = 128
MIN_ROWS = 16  # bf16 sublane packing -> keep batch tiles multiples of 16


def _round_up(n, m):
    return ((n + m - 1) // m) * m


def _pad2(a, rows, cols):
    return jnp.pad(a, ((0, rows - a.shape[0]), (0, cols - a.shape[1])))


# ------------------------- Pallas kernel (hot path) -------------------------
def _vae_forward_kernel(
    x_ref, eps_ref,                       # streamed activations / noise (bf16)
    w1_ref, wh_ref, w2_ref, wout_ref,     # bf16 weights (VMEM-resident)
    b_ref,                                # packed f32 biases (1, 2H+2L+D)
    recon_mu_ref, z_ref,                  # outputs (bf16, f32)
    *, Hp, Lp, Dp, chunk_rows, n_chunks,
):
    # Static lane-aligned slices of the packed bias vector.
    b1 = b_ref[:, 0:Hp]
    bh = b_ref[:, Hp:Hp + 2 * Lp]
    b2 = b_ref[:, Hp + 2 * Lp:2 * Hp + 2 * Lp]
    bout = b_ref[:, 2 * Hp + 2 * Lp:2 * Hp + 2 * Lp + Dp]

    w1 = w1_ref[...]
    wh = wh_ref[...]
    w2 = w2_ref[...]
    wout = wout_ref[...]

    # Two independent row sub-chunks (static slices) so the LLO scheduler can
    # overlap chunk-0 EUP/VPU work (tanh/exp/casts) with chunk-1 MXU matmuls.
    for c in range(n_chunks):
        rows = slice(c * chunk_rows, (c + 1) * chunk_rows)

        # ---- encoder trunk: bf16 MXU matmul, f32 accumulate ----
        h = jnp.tanh(
            jnp.dot(x_ref[rows, :], w1, preferred_element_type=jnp.float32) + b1
        )                                                    # (chunk, Hp) f32

        # ---- fused (mu, log_std) heads: one (Hp, 2*Lp) matmul ----
        heads = (
            jnp.dot(h.astype(jnp.bfloat16), wh,
                    preferred_element_type=jnp.float32) + bh
        )                                                    # (chunk, 2*Lp) f32
        q_mu = heads[:, :Lp]
        q_log_std = heads[:, Lp:]

        # ---- reparameterized sample z = mu + sigma * eps (f32 on VPU/EUP) ----
        eps = eps_ref[rows, :].astype(jnp.float32)           # bf16 stream -> f32
        z = q_mu + jnp.exp(q_log_std) * eps                  # (chunk, Lp)
        z_ref[rows, :] = z

        # ---- decoder ----
        hd = jnp.tanh(
            jnp.dot(z.astype(jnp.bfloat16), w2,
                    preferred_element_type=jnp.float32) + b2
        )                                                    # (chunk, Hp)
        recon = jnp.dot(hd.astype(jnp.bfloat16), wout,
                        preferred_element_type=jnp.float32) + bout
        recon_mu_ref[rows, :] = recon.astype(recon_mu_ref.dtype)


# --------------------- one-time parameter packing / padding ------------------
def pack_params(p):
    """Pad to lane-multiples, fuse the mu/log_std heads, pack biases, cast bf16."""
    D, H = p["w1"].shape
    L = p["wmu"].shape[1]
    Dp, Hp, Lp = _round_up(D, LANE), _round_up(H, LANE), _round_up(L, LANE)

    w1 = _pad2(p["w1"], Dp, Hp).astype(jnp.bfloat16)
    wheads = jnp.concatenate(
        [_pad2(p["wmu"], Hp, Lp), _pad2(p["wls"], Hp, Lp)], axis=1
    ).astype(jnp.bfloat16)                                   # (Hp, 2*Lp)
    w2 = _pad2(p["w2"], Lp, Hp).astype(jnp.bfloat16)
    wout = _pad2(p["wout"], Hp, Dp).astype(jnp.bfloat16)

    biases = jnp.concatenate(
        [_pad2(p["b1"], 1, Hp),
         _pad2(p["bmu"], 1, Lp), _pad2(p["bls"], 1, Lp),
         _pad2(p["b2"], 1, Hp),
         _pad2(p["bout"], 1, Dp)], axis=1
    ).astype(jnp.float32)                                    # (1, 2Hp+2Lp+Dp)

    return {"w1": w1, "wheads": wheads, "w2": w2, "wout": wout,
            "biases": biases, "dec_log_std": p["dec_log_std"]}


# ------------------------ tiling / VMEM budget planning ----------------------
def _vmem_plan(B, Dp, Hp, Lp, single_buffer):
    """Pick TILE_B / grid / vmem_limit from actual buffer sizes."""
    weight_bytes = (2 * (Dp * Hp + Hp * 2 * Lp + Lp * Hp + Hp * Dp)      # bf16
                    + 4 * (2 * Hp + 2 * Lp + Dp))                        # f32 bias
    wmul = 1 if single_buffer else 2

    def stream_bytes(tile_b):
        per_row = (2 * Dp + 2 * Lp      # x bf16, eps bf16 in
                   + 2 * Dp + 4 * Lp)   # recon_mu bf16, z f32 out
        interm = 4 * (2 * Hp + 2 * Lp)  # rough f32 intermediates (h, hd, heads)
        return tile_b * (2 * per_row + interm)   # streams are double-buffered

    budget = 40 << 20                   # conservative: fits v7x's 64 MiB VMEM
    tile_b = min(512, _round_up(B, MIN_ROWS))
    while tile_b > MIN_ROWS and wmul * weight_bytes + stream_bytes(tile_b) > budget:
        tile_b = max(MIN_ROWS, _round_up(tile_b // 2, MIN_ROWS))

    bp = _round_up(B, tile_b)
    # v7x megacore: guarantee >= 2 grid steps so the "parallel" batch axis has
    # work for both TensorCores (neutral on single-TC v5e/v6e).
    if bp // tile_b < 2 and bp >= 2 * MIN_ROWS:
        tile_b = _round_up((bp + 1) // 2, MIN_ROWS)
        bp = _round_up(B, tile_b)

    needed = wmul * weight_bytes + stream_bytes(tile_b)
    vmem_limit = int(min(max(32 << 20, int(1.25 * needed) + (4 << 20)), 48 << 20))
    n_chunks = 2 if tile_b >= 256 else 1   # keep sub-chunks >= 128 rows
    return tile_b, bp, n_chunks, vmem_limit


# ------------------------------- wrapper ------------------------------------
def _build_forward(B, D, L, Dp, Hp, Lp, single_buffer):
    TILE_B, Bp, n_chunks, vmem_limit = _vmem_plan(B, Dp, Hp, Lp, single_buffer)
    Btot = 2 * Hp + 2 * Lp + Dp

    kernel = functools.partial(
        _vae_forward_kernel, Hp=Hp, Lp=Lp, Dp=Dp,
        chunk_rows=TILE_B // n_chunks, n_chunks=n_chunks)

    resident_kw = {"pipeline_mode": pl.Buffered(1)} if single_buffer else {}

    def resident(shape):
        # Constant index_map -> never re-fetched; single buffer suffices.
        return pl.BlockSpec(shape, lambda i: (0, 0), **resident_kw)

    call = pl.pallas_call(
        kernel,
        out_shape=(
            jax.ShapeDtypeStruct((Bp, Dp), jnp.bfloat16),    # recon_mu (padded)
            jax.ShapeDtypeStruct((Bp, Lp), jnp.float32),     # z (padded)
        ),
        grid_spec=pltpu.PrefetchScalarGridSpec(
            num_scalar_prefetch=0,
            grid=(Bp // TILE_B,),
            in_specs=[
                pl.BlockSpec((TILE_B, Dp), lambda i: (i, 0)),    # x tile (bf16)
                pl.BlockSpec((TILE_B, Lp), lambda i: (i, 0)),    # eps tile (bf16)
                resident((Dp, Hp)),                              # w1
                resident((Hp, 2 * Lp)),                          # fused heads
                resident((Lp, Hp)),                              # w2
                resident((Hp, Dp)),                              # wout
                resident((1, Btot)),                             # packed biases
            ],
            out_specs=(
                pl.BlockSpec((TILE_B, Dp), lambda i: (i, 0)),
                pl.BlockSpec((TILE_B, Lp), lambda i: (i, 0)),
            ),
        ),
        compiler_params=pltpu.CompilerParams(
            dimension_semantics=("parallel",),               # shard batch on v7x TCs
            vmem_limit_bytes=vmem_limit,
        ),
    )

    @jax.jit
    def fwd(x, eps, packed):
        xp = _pad2(x, Bp, Dp).astype(jnp.bfloat16)           # bf16 MXU operand
        epsp = _pad2(eps, Bp, Lp).astype(jnp.bfloat16)       # bf16 stream
        recon_mu_p, z_p = call(
            xp, epsp, packed["w1"], packed["wheads"], packed["w2"],
            packed["wout"], packed["biases"])
        # TODO(synk): if downstream can consume the padded (Bp, Dp) slab, drop
        #             this slice to avoid the extra copy when D << Dp.
        recon_mu = recon_mu_p[:B, :D].astype(jnp.float32)
        z = z_p[:B, :L]
        # Decoder scale is a learned per-feature constant: broadcast in the
        # wrapper, never materialized / DMA'd by the kernel.
        recon_log_std = jnp.broadcast_to(packed["dec_log_std"][:, :D], (B, D))
        return recon_mu, recon_log_std, z

    return fwd


_FWD_CACHE = {}


def vae_forward(x, eps, packed):
    """Returns (recon_mu, recon_log_std, z): decoder distribution params + sample."""
    B, D = x.shape
    L = eps.shape[1]
    Dp, Hp = packed["w1"].shape
    Lp = packed["wheads"].shape[1] // 2
    key = (B, D, L, Dp, Hp, Lp)

    fwd = _FWD_CACHE.get(key)
    if fwd is not None:
        return fwd(x, eps, packed)

    err = None
    for single_buffer in (True, False):   # fall back if Buffered(1) is rejected
        cand = _build_forward(B, D, L, Dp, Hp, Lp, single_buffer)
        try:
            out = cand(x, eps, packed)
            jax.block_until_ready(out)
        except Exception as e:            # noqa: BLE001 - rebuild w/ default buffering
            err = e
            continue
        _FWD_CACHE[key] = cand
        return out
    raise err


# ------------------------- deterministic param init -------------------------
def init_params(key, data_dim, hidden_dim, latent_dim):
    ks = jax.random.split(key, 6)
    s = lambda fan_in: 1.0 / jnp.sqrt(jnp.float32(fan_in))
    return {
        # encoder
        "w1":  jax.random.normal(ks[0], (data_dim, hidden_dim), jnp.float32) * s(data_dim),
        "b1":  jnp.zeros((1, hidden_dim), jnp.float32),
        "wmu": jax.random.normal(ks[1], (hidden_dim, latent_dim), jnp.float32) * s(hidden_dim),
        "bmu": jnp.zeros((1, latent_dim), jnp.float32),
        "wls": jax.random.normal(ks[2], (hidden_dim, latent_dim), jnp.float32) * s(hidden_dim),
        "bls": jnp.zeros((1, latent_dim), jnp.float32),
        # decoder
        "w2":   jax.random.normal(ks[3], (latent_dim, hidden_dim), jnp.float32) * s(latent_dim),
        "b2":   jnp.zeros((1, hidden_dim), jnp.float32),
        "wout": jax.random.normal(ks[4], (hidden_dim, data_dim), jnp.float32) * s(hidden_dim),
        "bout": jnp.zeros((1, data_dim), jnp.float32),
        "dec_log_std": jnp.zeros((1, data_dim), jnp.float32),
    }


# ------------------------- pure-JAX reference check -------------------------
def vae_forward_ref(x, eps, p):
    bf16 = jnp.bfloat16
    dot = lambda a, w: jnp.dot(a.astype(bf16), w.astype(bf16),
                               preferred_element_type=jnp.float32)
    h = jnp.tanh(dot(x, p["w1"]) + p["b1"])
    q_mu = dot(h, p["wmu"]) + p["bmu"]
    q_ls = dot(h, p["wls"]) + p["bls"]
    eps_bf = eps.astype(bf16).astype(jnp.float32)   # kernel streams eps as bf16
    z = q_mu + jnp.exp(q_ls) * eps_bf
    hd = jnp.tanh(dot(z, p["w2"]) + p["b2"])
    recon_mu = dot(hd, p["wout"]) + p["bout"]
    recon_ls = jnp.broadcast_to(p["dec_log_std"], recon_mu.shape)
    return recon_mu, recon_ls, z


if __name__ == "__main__":
    B, D, H, L = 8, 32, 64, 16   # batch, data dim, hidden dim, latent dim

    key = jax.random.PRNGKey(0)
    k_x, k_eps, k_params = jax.random.split(key, 3)

    x = jax.random.normal(k_x, (B, D), jnp.float32)
    eps = jax.random.normal(k_eps, (B, L), jnp.float32)     # rsample noise
    params = init_params(k_params, D, H, L)
    packed = pack_params(params)                            # one-time packing

    recon_mu, recon_log_std, z = jax.block_until_ready(vae_forward(x, eps, packed))

    ref_mu, ref_ls, ref_z = vae_forward_ref(x, eps, params)
    assert recon_mu.shape == (B, D) and recon_log_std.shape == (B, D) and z.shape == (B, L)
    assert jnp.allclose(z, ref_z, atol=1e-2, rtol=1e-2)
    assert jnp.allclose(recon_mu, ref_mu, atol=2e-2, rtol=2e-2)
    assert jnp.allclose(recon_log_std, ref_ls, atol=1e-5, rtol=1e-5)

    print("KERNEL_OK")
</pallas_src>

<mosaic_0001>
module attributes {stable_mosaic.version = 11 : i64} {
  func.func @_vae_forward_kernel(%arg0: i32, %arg1: memref<16x128xbf16, #tpu.memory_space<vmem>>, %arg2: memref<16x128xbf16, #tpu.memory_space<vmem>>, %arg3: memref<128x128xbf16, #tpu.memory_space<vmem>>, %arg4: memref<128x256xbf16, #tpu.memory_space<vmem>>, %arg5: memref<128x128xbf16, #tpu.memory_space<vmem>>, %arg6: memref<128x128xbf16, #tpu.memory_space<vmem>>, %arg7: memref<1x640xf32, #tpu.memory_space<vmem>>, %arg8: memref<16x128xbf16, #tpu.memory_space<vmem>>, %arg9: memref<16x128xf32, #tpu.memory_space<vmem>>) attributes {dimension_semantics = [#tpu.dimension_semantics<parallel>], iteration_bounds = array<i64: 1>, scalar_prefetch = 0 : i64, scratch_operands = 0 : i64, tpu.core_type = #tpu.core_type<tc>, window_params = [{transform_indices = @transform_0, window_bounds = array<i64: 16, 128>}, {transform_indices = @transform_1, window_bounds = array<i64: 16, 128>}, {pipeline_mode = #tpu.pipeline_mode<synchronous>, transform_indices = @transform_2, window_bounds = array<i64: 128, 128>}, {pipeline_mode = #tpu.pipeline_mode<synchronous>, transform_indices = @transform_3, window_bounds = array<i64: 128, 256>}, {pipeline_mode = #tpu.pipeline_mode<synchronous>, transform_indices = @transform_4, window_bounds = array<i64: 128, 128>}, {pipeline_mode = #tpu.pipeline_mode<synchronous>, transform_indices = @transform_5, window_bounds = array<i64: 128, 128>}, {pipeline_mode = #tpu.pipeline_mode<synchronous>, transform_indices = @transform_6, window_bounds = array<i64: 1, 640>}, {transform_indices = @transform_7, window_bounds = array<i64: 16, 128>}, {transform_indices = @transform_8, window_bounds = array<i64: 16, 128>}]} {
    %c0 = arith.constant 0 : index
    %c0_0 = arith.constant 0 : index
    %0 = vector.load %arg7[%c0, %c0_0] : memref<1x640xf32, #tpu.memory_space<vmem>>, vector<1x128xf32>
    %c0_1 = arith.constant 0 : index
    %c128 = arith.constant 128 : index
    %1 = vector.load %arg7[%c0_1, %c128] : memref<1x640xf32, #tpu.memory_space<vmem>>, vector<1x256xf32>
    %c0_2 = arith.constant 0 : index
    %c384 = arith.constant 384 : index
    %2 = vector.load %arg7[%c0_2, %c384] : memref<1x640xf32, #tpu.memory_space<vmem>>, vector<1x128xf32>
    %c0_3 = arith.constant 0 : index
    %c512 = arith.constant 512 : index
    %3 = vector.load %arg7[%c0_3, %c512] : memref<1x640xf32, #tpu.memory_space<vmem>>, vector<1x128xf32>
    %c0_4 = arith.constant 0 : index
    %c0_5 = arith.constant 0 : index
    %4 = vector.load %arg3[%c0_4, %c0_5] : memref<128x128xbf16, #tpu.memory_space<vmem>>, vector<128x128xbf16>
    %c0_6 = arith.constant 0 : index
    %c0_7 = arith.constant 0 : index
    %5 = vector.load %arg4[%c0_6, %c0_7] : memref<128x256xbf16, #tpu.memory_space<vmem>>, vector<128x256xbf16>
    %c0_8 = arith.constant 0 : index
    %c0_9 = arith.constant 0 : index
    %6 = vector.load %arg5[%c0_8, %c0_9] : memref<128x128xbf16, #tpu.memory_space<vmem>>, vector<128x128xbf16>
    %c0_10 = arith.constant 0 : index
    %c0_11 = arith.constant 0 : index
    %7 = vector.load %arg6[%c0_10, %c0_11] : memref<128x128xbf16, #tpu.memory_space<vmem>>, vector<128x128xbf16>
    %c0_12 = arith.constant 0 : index
    %c0_13 = arith.constant 0 : index
    %8 = vector.load %arg1[%c0_12, %c0_13] : memref<16x128xbf16, #tpu.memory_space<vmem>>, vector<16x128xbf16>
    %cst = arith.constant dense<0.000000e+00> : vector<16x128xf32>
    %9 = tpu.matmul %8, %4, %cst {dimension_numbers = #tpu.dot_dimension_numbers<[1], [0], [0], [1], [0, 0, 1, 1], [], []>} : vector<16x128xbf16>, vector<128x128xbf16>, vector<16x128xf32> -> vector<16x128xf32>
    %10 = vector.broadcast %0 : vector<1x128xf32> to vector<16x128xf32>
    %11 = arith.addf %9, %10 : vector<16x128xf32>
    %12 = math.tanh %11 : vector<16x128xf32>
    %13 = arith.truncf %12 : vector<16x128xf32> to vector<16x128xbf16>
    %cst_14 = arith.constant dense<0.000000e+00> : vector<16x256xf32>
    %14 = tpu.matmul %13, %5, %cst_14 {dimension_numbers = #tpu.dot_dimension_numbers<[1], [0], [0], [1], [0, 0, 1, 1], [], []>} : vector<16x128xbf16>, vector<128x256xbf16>, vector<16x256xf32> -> vector<16x256xf32>
    %15 = vector.broadcast %1 : vector<1x256xf32> to vector<16x256xf32>
    %16 = arith.addf %14, %15 : vector<16x256xf32>
    %17 = vector.extract_strided_slice %16 {offsets = [0, 0], sizes = [16, 128], strides = [1, 1]} : vector<16x256xf32> to vector<16x128xf32>
    %18 = vector.extract_strided_slice %16 {offsets = [0, 128], sizes = [16, 128], strides = [1, 1]} : vector<16x256xf32> to vector<16x128xf32>
    %c0_15 = arith.constant 0 : index
    %c0_16 = arith.constant 0 : index
    %19 = vector.load %arg2[%c0_15, %c0_16] : memref<16x128xbf16, #tpu.memory_space<vmem>>, vector<16x128xbf16>
    %20 = arith.extf %19 : vector<16x128xbf16> to vector<16x128xf32>
    %21 = math.exp %18 : vector<16x128xf32>
    %22 = arith.mulf %21, %20 : vector<16x128xf32>
    %23 = arith.addf %17, %22 : vector<16x128xf32>
    %c0_17 = arith.constant 0 : index
    %c0_18 = arith.constant 0 : index
    %24 = vector.load %arg9[%c0_17, %c0_18] : memref<16x128xf32, #tpu.memory_space<vmem>>, vector<16x128xf32>
    tpu.vector_store %arg9[%c0_17, %c0_18], %23 {strides = array<i32>} : memref<16x128xf32, #tpu.memory_space<vmem>>, vector<16x128xf32>,
    %25 = arith.truncf %23 : vector<16x128xf32> to vector<16x128xbf16>
    %cst_19 = arith.constant dense<0.000000e+00> : vector<16x128xf32>
    %26 = tpu.matmul %25, %6, %cst_19 {dimension_numbers = #tpu.dot_dimension_numbers<[1], [0], [0], [1], [0, 0, 1, 1], [], []>} : vector<16x128xbf16>, vector<128x128xbf16>, vector<16x128xf32> -> vector<16x128xf32>
    %27 = vector.broadcast %2 : vector<1x128xf32> to vector<16x128xf32>
    %28 = arith.addf %26, %27 : vector<16x128xf32>
    %29 = math.tanh %28 : vector<16x128xf32>
    %30 = arith.truncf %29 : vector<16x128xf32> to vector<16x128xbf16>
    %cst_20 = arith.constant dense<0.000000e+00> : vector<16x128xf32>
    %31 = tpu.matmul %30, %7, %cst_20 {dimension_numbers = #tpu.dot_dimension_numbers<[1], [0], [0], [1], [0, 0, 1, 1], [], []>} : vector<16x128xbf16>, vector<128x128xbf16>, vector<16x128xf32> -> vector<16x128xf32>
    %32 = vector.broadcast %3 : vector<1x128xf32> to vector<16x128xf32>
    %33 = arith.addf %31, %32 : vector<16x128xf32>
    %34 = arith.truncf %33 : vector<16x128xf32> to vector<16x128xbf16>
    %c0_21 = arith.constant 0 : index
    %c0_22 = arith.constant 0 : index
    %35 = vector.load %arg8[%c0_21, %c0_22] : memref<16x128xbf16, #tpu.memory_space<vmem>>, vector<16x128xbf16>
    tpu.vector_store %arg8[%c0_21, %c0_22], %34 {strides = array<i32>} : memref<16x128xbf16, #tpu.memory_space<vmem>>, vector<16x128xbf16>,
    return
  }
  func.func @transform_0(%arg0: i32) -> (i32, i32) {
    %c0_i32 = arith.constant 0 : i32
    %c0_i32_0 = arith.constant 0 : i32
    return %arg0, %c0_i32 : i32, i32
  }
  func.func @transform_1(%arg0: i32) -> (i32, i32) {
    %c0_i32 = arith.constant 0 : i32
    %c0_i32_0 = arith.constant 0 : i32
    return %arg0, %c0_i32 : i32, i32
  }
  func.func @transform_2(%arg0: i32) -> (i32, i32) {
    %c0_i32 = arith.constant 0 : i32
    %c0_i32_0 = arith.constant 0 : i32
    %c0_i32_1 = arith.constant 0 : i32
    return %c0_i32, %c0_i32_0 : i32, i32
  }
  func.func @transform_3(%arg0: i32) -> (i32, i32) {
    %c0_i32 = arith.constant 0 : i32
    %c0_i32_0 = arith.constant 0 : i32
    %c0_i32_1 = arith.constant 0 : i32
    return %c0_i32, %c0_i32_0 : i32, i32
  }
  func.func @transform_4(%arg0: i32) -> (i32, i32) {
    %c0_i32 = arith.constant 0 : i32
    %c0_i32_0 = arith.constant 0 : i32
    %c0_i32_1 = arith.constant 0 : i32
    return %c0_i32, %c0_i32_0 : i32, i32
  }
  func.func @transform_5(%arg0: i32) -> (i32, i32) {
    %c0_i32 = arith.constant 0 : i32
    %c0_i32_0 = arith.constant 0 : i32
    %c0_i32_1 = arith.constant 0 : i32
    return %c0_i32, %c0_i32_0 : i32, i32
  }
  func.func @transform_6(%arg0: i32) -> (i32, i32) {
    %c0_i32 = arith.constant 0 : i32
    %c0_i32_0 = arith.constant 0 : i32
    %c0_i32_1 = arith.constant 0 : i32
    return %c0_i32, %c0_i32_0 : i32, i32
  }
  func.func @transform_7(%arg0: i32) -> (i32, i32) {
    %c0_i32 = arith.constant 0 : i32
    %c0_i32_0 = arith.constant 0 : i32
    return %arg0, %c0_i32 : i32, i32
  }
  func.func @transform_8(%arg0: i32) -> (i32, i32) {
    %c0_i32 = arith.constant 0 : i32
    %c0_i32_0 = arith.constant 0 : i32
    return %arg0, %c0_i32 : i32, i32
  }
}

module attributes {stable_mosaic.version = 11 : i64} {
  func.func @_vae_forward_kernel(%arg0: i32, %arg1: memref<16x128xbf16, #tpu.memory_space<vmem>>, %arg2: memref<16x128xbf16, #tpu.memory_space<vmem>>, %arg3: memref<128x128xbf16, #tpu.memory_space<vmem>>, %arg4: memref<128x256xbf16, #tpu.memory_space<vmem>>, %arg5: memref<128x128xbf16, #tpu.memory_space<vmem>>, %arg6: memref<128x128xbf16, #tpu.memory_space<vmem>>, %arg7: memref<1x640xf32, #tpu.memory_space<vmem>>, %arg8: memref<16x128xbf16, #tpu.memory_space<vmem>>, %arg9: memref<16x128xf32, #tpu.memory_space<vmem>>) attributes {dimension_semantics = [#tpu.dimension_semantics<parallel>], iteration_bounds = array<i64: 1>, scalar_prefetch = 0 : i64, scratch_operands = 0 : i64, tpu.core_type = #tpu.core_type<tc>, window_params = [{transform_indices = @transform_0, window_bounds = array<i64: 16, 128>}, {transform_indices = @transform_1, window_bounds = array<i64: 16, 128>}, {pipeline_mode = #tpu.pipeline_mode<synchronous>, transform_indices = @transform_2, window_bounds = array<i64: 128, 128>}, {pipeline_mode = #tpu.pipeline_mode<synchronous>, transform_indices = @transform_3, window_bounds = array<i64: 128, 256>}, {pipeline_mode = #tpu.pipeline_mode<synchronous>, transform_indices = @transform_4, window_bounds = array<i64: 128, 128>}, {pipeline_mode = #tpu.pipeline_mode<synchronous>, transform_indices = @transform_5, window_bounds = array<i64: 128, 128>}, {pipeline_mode = #tpu.pipeline_mode<synchronous>, transform_indices = @transform_6, window_bounds = array<i64: 1, 640>}, {transform_indices = @transform_7, window_bounds = array<i64: 16, 128>}, {transform_indices = @transform_8, window_bounds = array<i64: 16, 128>}]} {
    %c0 = arith.constant 0 : index
    %c0_0 = arith.constant 0 : index
    %0 = vector.load %arg7[%c0, %c0_0] : memref<1x640xf32, #tpu.memory_space<vmem>>, vector<1x128xf32>
    %c0_1 = arith.constant 0 : index
    %c128 = arith.constant 128 : index
    %1 = vector.load %arg7[%c0_1, %c128] : memref<1x640xf32, #tpu.memory_space<vmem>>, vector<1x256xf32>
    %c0_2 = arith.constant 0 : index
    %c384 = arith.constant 384 : index
    %2 = vector.load %arg7[%c0_2, %c384] : memref<1x640xf32, #tpu.memory_space<vmem>>, vector<1x128xf32>
    %c0_3 = arith.constant 0 : index
    %c512 = arith.constant 512 : index
    %3 = vector.load %arg7[%c0_3, %c512] : memref<1x640xf32, #tpu.memory_space<vmem>>, vector<1x128xf32>
    %c0_4 = arith.constant 0 : index
    %c0_5 = arith.constant 0 : index
    %4 = vector.load %arg3[%c0_4, %c0_5] : memref<128x128xbf16, #tpu.memory_space<vmem>>, vector<128x128xbf16>
    %c0_6 = arith.constant 0 : index
    %c0_7 = arith.constant 0 : index
    %5 = vector.load %arg4[%c0_6, %c0_7] : memref<128x256xbf16, #tpu.memory_space<vmem>>, vector<128x256xbf16>
    %c0_8 = arith.constant 0 : index
    %c0_9 = arith.constant 0 : index
    %6 = vector.load %arg5[%c0_8, %c0_9] : memref<128x128xbf16, #tpu.memory_space<vmem>>, vector<128x128xbf16>
    %c0_10 = arith.constant 0 : index
    %c0_11 = arith.constant 0 : index
    %7 = vector.load %arg6[%c0_10, %c0_11] : memref<128x128xbf16, #tpu.memory_space<vmem>>, vector<128x128xbf16>
    %c0_12 = arith.constant 0 : index
    %c0_13 = arith.constant 0 : index
    %8 = vector.load %arg1[%c0_12, %c0_13] : memref<16x128xbf16, #tpu.memory_space<vmem>>, vector<16x128xbf16>
    %cst = arith.constant dense<0.000000e+00> : vector<16x128xf32>
    %9 = tpu.matmul %8, %4, %cst {dimension_numbers = #tpu.dot_dimension_numbers<[1], [0], [0], [1], [0, 0, 1, 1], [], []>} : vector<16x128xbf16>, vector<128x128xbf16>, vector<16x128xf32> -> vector<16x128xf32>
    %10 = vector.broadcast %0 : vector<1x128xf32> to vector<16x128xf32>
    %11 = arith.addf %9, %10 : vector<16x128xf32>
    %12 = math.tanh %11 : vector<16x128xf32>
    %13 = arith.truncf %12 : vector<16x128xf32> to vector<16x128xbf16>
    %cst_14 = arith.constant dense<0.000000e+00> : vector<16x256xf32>
    %14 = tpu.matmul %13, %5, %cst_14 {dimension_numbers = #tpu.dot_dimension_numbers<[1], [0], [0], [1], [0, 0, 1, 1], [], []>} : vector<16x128xbf16>, vector<128x256xbf16>, vector<16x256xf32> -> vector<16x256xf32>
    %15 = vector.broadcast %1 : vector<1x256xf32> to vector<16x256xf32>
    %16 = arith.addf %14, %15 : vector<16x256xf32>
    %17 = vector.extract_strided_slice %16 {offsets = [0, 0], sizes = [16, 128], strides = [1, 1]} : vector<16x256xf32> to vector<16x128xf32>
    %18 = vector.extract_strided_slice %16 {offsets = [0, 128], sizes = [16, 128], strides = [1, 1]} : vector<16x256xf32> to vector<16x128xf32>
    %c0_15 = arith.constant 0 : index
    %c0_16 = arith.constant 0 : index
    %19 = vector.load %arg2[%c0_15, %c0_16] : memref<16x128xbf16, #tpu.memory_space<vmem>>, vector<16x128xbf16>
    %20 = arith.extf %19 : vector<16x128xbf16> to vector<16x128xf32>
    %21 = math.exp %18 : vector<16x128xf32>
    %22 = arith.mulf %21, %20 : vector<16x128xf32>
    %23 = arith.addf %17, %22 : vector<16x128xf32>
    %c0_17 = arith.constant 0 : index
    %c0_18 = arith.constant 0 : index
    %24 = vector.load %arg9[%c0_17, %c0_18] : memref<16x128xf32, #tpu.memory_space<vmem>>, vector<16x128xf32>
    tpu.vector_store %arg9[%c0_17, %c0_18], %23 {strides = array<i32>} : memref<16x128xf32, #tpu.memory_space<vmem>>, vector<16x128xf32>,
    %25 = arith.truncf %23 : vector<16x128xf32> to vector<16x128xbf16>
    %cst_19 = arith.constant dense<0.000000e+00> : vector<16x128xf32>
    %26 = tpu.matmul %25, %6, %cst_19 {dimension_numbers = #tpu.dot_dimension_numbers<[1], [0], [0], [1], [0, 0, 1, 1], [], []>} : vector<16x128xbf16>, vector<128x128xbf16>, vector<16x128xf32> -> vector<16x128xf32>
    %27 = vector.broadcast %2 : vector<1x128xf32> to vector<16x128xf32>
    %28 = arith.addf %26, %27 : vector<16x128xf32>
    %29 = math.tanh %28 : vector<16x128xf32>
    %30 = arith.truncf %29 : vector<16x128xf32> to vector<16x128xbf16>
    %cst_20 = arith.constant dense<0.000000e+00> : vector<16x128xf32>
    %31 = tpu.matmul %30, %7, %cst_20 {dimension_numbers = #tpu.dot_dimension_numbers<[1], [0], [0], [1], [0, 0, 1, 1], [], []>} : vector<16x128xbf16>, vector<128x128xbf16>, vector<16x128xf32> -> vector<16x128xf32>
    %32 = vector.broadcast %3 : vector<1x128xf32> to vector<16x128xf32>
    %33 = arith.addf %31, %32 : vector<16x128xf32>
    %34 = arith.truncf %33 : vector<16x128xf32> to vector<16x128xbf16>
    %c0_21 = arith.constant 0 : index
    %c0_22 = arith.constant 0 : index
    %35 = vector.load %arg8[%c0_21, %c0_22] : memref<16x128xbf16, #tpu.memory_space<vmem>>, vector<16x128xbf16>
    tpu.vector_store %arg8[%c0_21, %c0_22], %34 {strides = array<i32>} : memref<16x128xbf16, #tpu.memory_space<vmem>>, vector<16x128xbf16>,
    return
  }
  func.func @transform_0(%arg0: i32) -> (i32, i32) {
    %c0_i32 = arith.constant 0 : i32
    %c0_i32_0 = arith.constant 0 : i32
    return %arg0, %c0_i32 : i32, i32
  }
  func.func @transform_1(%arg0: i32) -> (i32, i32) {
    %c0_i32 = arith.constant 0 : i32
    %c0_i32_0 = arith.constant 0 : i32
    return %arg0, %c0_i32 : i32, i32
  }
  func.func @transform_2(%arg0: i32) -> (i32, i32) {
    %c0_i32 = arith.constant 0 : i32
    %c0_i32_0 = arith.constant 0 : i32
    %c0_i32_1 = arith.constant 0 : i32
    return %c0_i32, %c0_i32_0 : i32, i32
  }
  func.func @transform_3(%arg0: i32) -> (i32, i32) {
    %c0_i32 = arith.constant 0 : i32
    %c0_i32_0 = arith.constant 0 : i32
    %c0_i32_1 = arith.constant 0 : i32
    return %c0_i32, %c0_i32_0 : i32, i32
  }
  func.func @transform_4(%arg0: i32) -> (i32, i32) {
    %c0_i32 = arith.constant 0 : i32
    %c0_i32_0 = arith.constant 0 : i32
    %c0_i32_1 = arith.constant 0 : i32
    return %c0_i32, %c0_i32_0 : i32, i32
  }
  func.func @transform_5(%arg0: i32) -> (i32, i32) {
    %c0_i32 = arith.constant 0 : i32
    %c0_i32_0 = arith.constant 0 : i32
    %c0_i32_1 = arith.constant 0 : i32
    return %c0_i32, %c0_i32_0 : i32, i32
  }
  func.func @transform_6(%arg0: i32) -> (i32, i32) {
    %c0_i32 = arith.constant 0 : i32
    %c0_i32_0 = arith.constant 0 : i32
    %c0_i32_1 = arith.constant 0 : i32
    return %c0_i32, %c0_i32_0 : i32, i32
  }
  func.func @transform_7(%arg0: i32) -> (i32, i32) {
    %c0_i32 = arith.constant 0 : i32
    %c0_i32_0 = arith.constant 0 : i32
    return %arg0, %c0_i32 : i32, i32
  }
  func.func @transform_8(%arg0: i32) -> (i32, i32) {
    %c0_i32 = arith.constant 0 : i32
    %c0_i32_0 = arith.constant 0 : i32
    return %arg0, %c0_i32 : i32, i32
  }
}

</mosaic_0001>

<bundles_post_ra>
// kernel: fwd.1
= control target key start
LH: loop header
LB: loop body
LE: loop exit
PB: predicated region body
PF: predicated region fallthrough
CT: control target
= control target key end

     0   :  { %14 = vsyncpa [#allocation3], 0  ;;  %s1108_s0 = inlined_call_operand.vmem [shape: bf16[16,128], index: 0, kind: input, shape index: {}]   ;;  %s1109_s1 = inlined_call_operand.vmem [shape: bf16[16,128], index: 1, kind: input, shape index: {}]   ;;  %s1110_s2 = inlined_call_operand.vmem [shape: bf16[128,128], index: 2, kind: input, shape index: {}]   ;;  %s1111_s3 = inlined_call_operand.hbm [shape: bf16[128,256], index: 3, kind: input, shape index: {}]   ;;  %s1112_s4 = inlined_call_operand.hbm [shape: bf16[128,128], index: 4, kind: input, shape index: {}]   ;;  %s1113_s5 = inlined_call_operand.hbm [shape: bf16[128,128], index: 5, kind: input, shape index: {}]   ;;  %s1114_s6 = inlined_call_operand.hbm [shape: f32[1,640], index: 6, kind: input, shape index: {}]   ;;  %s1115_s7 = inlined_call_operand.vmem [shape: bf16[16,128], index: 7, kind: output, shape index: {0}]   ;;  %s1116_s8 = inlined_call_operand.vmem [shape: f32[16,128], index: 8, kind: output, shape index: {1}]  }
   0x1   :  { %15 = vsyncpa [#allocation5], 0 }
   0x2   :  { %16 = vsyncpa [#allocation8], 0  ;;  %s929_s27 = smov [#allocation4]   ;;  %s835_s9 = scalar_lea.hbm %s1112_s4, 1024 }
   0x3   :  { %s40_s28 = sshll.u32 %s929_s27, 4  ;;  %p836_p0 = scmp.ne.s32.totalorder %s1112_s4, %s835_s9  ;;  %s41_s28 = int_to_ptr.vmem [resolvable:$true] %s40_s28 }
   0x4   :  { %p839_p1 = scmp.lt.u32.totalorder %s835_s9, %s1112_s4 }
   0x6   :  { %p841_p2 = pnand %p839_p1, %p836_p0 }
   0x8   :  { %844 = shalt.err (!%p841_p2)
}
   0x9   :  { %s845_s14 = scalar_lea.vmem %s41_s28, 1024  ;;  %p850_p4 = scmp.lt.s32.totalorder %s41_s28, %s41_s28 }
   0xa   :  { %p846_p3 = scmp.ne.s32.totalorder %s41_s28, %s845_s14  ;;  %p851_p5 = scmp.lt.s32.totalorder %s845_s14, %s845_s14 }
   0xc   :  { %p852_p6 = por %p851_p5, %p850_p4 }
   0xe   :  { %p853_p7 = pnand %p852_p6, %p846_p3 }
  0x10   :  { %856 = shalt.err (!%p853_p7)
}
  0x11   :  { %s930_s15 = smov 64   ;;  %s931_s16 = smov 4  }
  0x12   :  { %46 = dma.hbm_to_vmem [thread:$0]  %s1112_s4, 1024, %s41_s28, [#allocation5], %s930_s15, %s930_s15, %s931_s16  }
  0x13   :  { %s932_s19 = smov [#allocation2]   ;;  %s857_s23 = scalar_lea.hbm %s1111_s3, 2048 }
  0x14   :  { %s28_s20 = sshll.u32 %s932_s19, 4  ;;  %p858_p8 = scmp.ne.s32.totalorder %s1111_s3, %s857_s23  ;;  %s29_s20 = int_to_ptr.vmem [resolvable:$true] %s28_s20 }
  0x15   :  { %p861_p9 = scmp.lt.u32.totalorder %s857_s23, %s1111_s3 }
  0x17   :  { %p863_p10 = pnand %p861_p9, %p858_p8 }
  0x19   :  { %866 = shalt.err (!%p863_p10)
}
  0x1a   :  { %s867_s29 = scalar_lea.vmem %s29_s20, 2048  ;;  %p872_p12 = scmp.lt.s32.totalorder %s29_s20, %s29_s20 }
  0x1b   :  { %p868_p11 = scmp.ne.s32.totalorder %s29_s20, %s867_s29  ;;  %p873_p13 = scmp.lt.s32.totalorder %s867_s29, %s867_s29 }
  0x1d   :  { %p874_p0 = por %p873_p13, %p872_p12 }
  0x1f   :  { %p875_p1 = pnand %p874_p0, %p868_p11 }
  0x21   :  { %878 = shalt.err (!%p875_p1)
}
  0x22   :  { %s933_s4 = smov 128   ;;  %s934_s28 = smov 8  }
  0x23   :  { %34 = dma.hbm_to_vmem [thread:$0]  %s1111_s3, 2048, %s29_s20, [#allocation3], %s933_s4, %s933_s4, %s934_s28  }
  0x24   :  { %s935_s10 = smov [#allocation6]   ;;  %s936_s12 = smov [#allocation7]  }
  0x25   :  { %s52_s11 = sshll.u32 %s935_s10, 4  ;;  %s65_s13 = sshll.u32 %s936_s12, 4  ;;  %s53_s11 = int_to_ptr.vmem [resolvable:$true] %s52_s11  ;;  %s66_s13 = int_to_ptr.vmem [resolvable:$true] %s65_s13 }
  0x26   :  { %s879_s18 = scalar_lea.hbm %s1113_s5, 1024 }
  0x27   :  { %p880_p2 = scmp.ne.s32.totalorder %s1113_s5, %s879_s18  ;;  %p883_p3 = scmp.lt.u32.totalorder %s879_s18, %s1113_s5 }
  0x29   :  { %p885_p4 = pnand %p883_p3, %p880_p2 }
  0x2b   :  { %888 = shalt.err (!%p885_p4)
}
  0x2c   :  { %s889_s3 = scalar_lea.vmem %s53_s11, 1024  ;;  %p894_p6 = scmp.lt.s32.totalorder %s53_s11, %s53_s11 }
  0x2d   :  { %p890_p5 = scmp.ne.s32.totalorder %s53_s11, %s889_s3  ;;  %p895_p7 = scmp.lt.s32.totalorder %s889_s3, %s889_s3 }
  0x2f   :  { %p896_p8 = por %p895_p7, %p894_p6 }
  0x31   :  { %p897_p9 = pnand %p896_p8, %p890_p5 }
  0x33   :  { %900 = shalt.err (!%p897_p9)
}
  0x34   :  { %58 = dma.hbm_to_vmem [thread:$0]  %s1113_s5, 1024, %s53_s11, [#allocation5], %s930_s15, %s930_s15, %s931_s16  }
  0x35   :  { %s901_s27 = scalar_lea.hbm %s1114_s6, 80 }
  0x36   :  { %p902_p10 = scmp.ne.s32.totalorder %s1114_s6, %s901_s27  ;;  %p905_p11 = scmp.lt.u32.totalorder %s901_s27, %s1114_s6 }
  0x38   :  { %p907_p12 = pnand %p905_p11, %p902_p10 }
  0x3a   :  { %910 = shalt.err (!%p907_p12)
}
  0x3b   :  { %s911_s9 = scalar_lea.vmem %s66_s13, 80  ;;  %s915_s10 = scalar_lea.vmem %s66_s13, 96 }
  0x3c   :  { %p912_p13 = scmp.ne.s32.totalorder %s66_s13, %s911_s9  ;;  %p916_p0 = scmp.lt.s32.totalorder %s66_s13, %s66_s13 }
  0x3d   :  { %p917_p1 = scmp.lt.s32.totalorder %s915_s10, %s911_s9 }
  0x3f   :  { %p918_p2 = por %p917_p1, %p916_p0 }
  0x41   :  { %p919_p3 = pnand %p918_p2, %p912_p13 }
  0x43   :  { %922 = shalt.err (!%p919_p3)
}
  0x44   :  { %68 = dma.hbm_to_vmem [thread:$0]  %s1114_s6, 80, %s66_s13, [#allocation8]  }
  0x45   :  { %923 = dma.done.wait [#allocation3], 2048  }
  0x46   :  { %924 = vsyncadd [#allocation3], 4294965248 }
  0x47   :  { %925 = dma.done.wait [#allocation5], 2048  }
  0x48   :  { %926 = vsyncadd [#allocation5], 4294965248 }
  0x49   :  { %927 = dma.done.wait [#allocation8], 80  }
  0x4a   :  { %928 = vsyncadd [#allocation8], 4294967216  ;;  %v937_v0 = vmov 0.0   ;;  %vm938_vm0 = vmmov 0   ;;  %v774_v1 = vld [vmem:[%s1110_s2] sm:$0xff]   ;;  %v775_v2 = vld [vmem:[%s1110_s2 + $0x8] sm:$0xff]   ;;  %v257_v49 = vlaneseq }
  0x4b   :  { %703 = vmatprep.subr.bf16.mxu0 %v937_v0  ;;  %719 = vmatprep.mubr.msk.bf16.mxu0 %vm938_vm0, %v937_v0  ;;  %v776_v3 = vld [vmem:[%s1110_s2 + $0x10] sm:$0xff]   ;;  %v777_v4 = vld [vmem:[%s1110_s2 + $0x18] sm:$0xff]   ;;  %v783_v5 = vld [vmem:[#allocation2 + $0x4] ss:$8 sps:$4 sm:$0xff]   ;;  %v939_v24 = vmov 0  }
  0x4c   :  { %704 = vmatpush3.bf16.msra.mxu0 %v774_v1  ;;  %v785_v6 = vld [vmem:[#allocation2] ss:$8 sps:$4 sm:$0xff]   ;;  %347 = vmatprep.subr.bf16.mxu1 %v783_v5  ;;  %v786_v7 = vld [vmem:[#allocation2 + $0x14] ss:$8 sps:$4 sm:$0xff]   ;;  %v788_v8 = vld [vmem:[#allocation2 + $0x10] ss:$8 sps:$4 sm:$0xff]  }
  0x4d   :  { %705 = vmatprep.subr.bf16.mxu0 %v937_v0  ;;  %348 = vmatpush1.bf16.msra.mxu1 %v785_v6  ;;  %v789_v9 = vld [vmem:[#allocation2 + $0x24] ss:$8 sps:$4 sm:$0xff]   ;;  %v791_v11 = vld [vmem:[#allocation2 + $0x20] ss:$8 sps:$4 sm:$0xff]   ;;  %v792_v12 = vld [vmem:[#allocation2 + $0x34] ss:$8 sps:$4 sm:$0xff]  }
  0x4e   :  { %349 = vmatprep.subr.bf16.mxu1 %v786_v7  ;;  %v778_v10 = vld [vmem:[%s1110_s2 + $0x20] sm:$0xff]   ;;  %v779_v13 = vld [vmem:[%s1110_s2 + $0x28] sm:$0xff]   ;;  %v794_v14 = vld [vmem:[#allocation2 + $0x30] ss:$8 sps:$4 sm:$0xff]   ;;  %379 = vmatprep.mubr.bf16.mxu1 %v939_v24  ;;  %v258_v50 = vshrl.u32 %v257_v49, 7 }
  0x4f   :  { %v780_v15 = vld [vmem:[%s1110_s2 + $0x30] sm:$0xff]   ;;  %v781_v16 = vld [vmem:[%s1110_s2 + $0x38] sm:$0xff]   ;;  %v782_v17 = vld [vmem:[%s1108_s0] sm:$0xff]  }
  0x50   :  { %706 = vmatpush3.bf16.msra.mxu0 %v775_v2  ;;  %v795_v18 = vld [vmem:[#allocation2 + $0x44] ss:$8 sps:$4 sm:$0xff]   ;;  %v797_v19 = vld [vmem:[#allocation2 + $0x40] ss:$8 sps:$4 sm:$0xff]   ;;  %v798_v20 = vld [vmem:[#allocation2 + $0x54] ss:$8 sps:$4 sm:$0xff]  }
  0x51   :  { %707 = vmatprep.subr.bf16.mxu0 %v937_v0  ;;  %350 = vmatpush1.bf16.msra.mxu1 %v788_v8  ;;  %v800_v21 = vld [vmem:[#allocation2 + $0x50] ss:$8 sps:$4 sm:$0xff]   ;;  %v801_v22 = vld [vmem:[#allocation2 + $0x64] ss:$8 sps:$4 sm:$0xff]   ;;  %v803_v23 = vld [vmem:[#allocation2 + $0x60] ss:$8 sps:$4 sm:$0xff]  }
  0x52   :  { %351 = vmatprep.subr.bf16.mxu1 %v789_v9  ;;  %v804_v25 = vld [vmem:[#allocation2 + $0x74] ss:$8 sps:$4 sm:$0xff]   ;;  %v806_v26 = vld [vmem:[#allocation2 + $0x70] ss:$8 sps:$4 sm:$0xff]   ;;  %v807_v27 = vld [vmem:[#allocation4] sm:$0xff]   ;;  %v263_v51 = vsub.s32 1, %v258_v50 }
  0x53   :  { %v808_v28 = vld [vmem:[#allocation4 + $0x8] sm:$0xff]   ;;  %v619_v29 = vld [vmem:[#allocation7] ss:$0 sm:$0xff]  ;;  %v809_v39 = vld [vmem:[#allocation4 + $0x10] sm:$0xff]   ;;  %v259_v62 = vsub.s32 0, %v258_v50 }
  0x54   :  { %708 = vmatpush3.bf16.msra.mxu0 %v776_v3  ;;  %v810_v40 = vld [vmem:[#allocation4 + $0x18] sm:$0xff]   ;;  %v811_v41 = vld [vmem:[#allocation4 + $0x20] sm:$0xff]   ;;  %v812_v42 = vld [vmem:[#allocation4 + $0x28] sm:$0xff]  }
  0x55   :  { %709 = vmatprep.subr.bf16.mxu0 %v937_v0  ;;  %352 = vmatpush1.bf16.msra.mxu1 %v791_v11  ;;  %v813_v43 = vld [vmem:[#allocation4 + $0x30] sm:$0xff]   ;;  %v814_v44 = vld [vmem:[#allocation4 + $0x38] sm:$0xff]   ;;  %v815_v45 = vld [vmem:[#allocation6] sm:$0xff]  }
  0x56   :  { %353 = vmatprep.subr.bf16.mxu1 %v792_v12  ;;  %v816_v46 = vld [vmem:[#allocation6 + $0x8] sm:$0xff]   ;;  %v817_v47 = vld [vmem:[#allocation6 + $0x10] sm:$0xff]   ;;  %v818_v48 = vld [vmem:[#allocation6 + $0x18] sm:$0xff]  }
  0x57   :  { %v83_v52 = vld [vmem:[#allocation7 + $0x1] sm:$0x3] }
  0x58   :  { %710 = vmatpush3.bf16.msra.mxu0 %v777_v4  ;;  %v264_v53 = vrot.slane %v83_v52, %v263_v51  ;;  %v668_v63 = vld [vmem:[%s1109_s1] sm:$0xff]   ;;  %v260_v1 = vrot.slane %v83_v52, %v259_v62 }
  0x59   :  { %711 = vmatprep.subr.bf16.mxu0 %v937_v0  ;;  %354 = vmatpush1.bf16.msra.mxu1 %v794_v14  ;;  %v669_v2 = vunpack.c.l.bf16 %v668_v63  ;;  %v670_v3 = vunpack.c.h.bf16 %v668_v63  ;;  %v820_v14 = vld [vmem:[#allocation6 + $0x28] sm:$0xff]  }
  0x5a   :  { %355 = vmatprep.subr.bf16.mxu1 %v795_v18 }
  0x5c   :  { %712 = vmatpush3.bf16.msra.mxu0 %v778_v10 }
  0x5d   :  { %713 = vmatprep.subr.bf16.mxu0 %v937_v0  ;;  %356 = vmatpush1.bf16.msra.mxu1 %v797_v19 }
  0x5e   :  { %357 = vmatprep.subr.bf16.mxu1 %v798_v20 }
  0x60   :  { %714 = vmatpush3.bf16.msra.mxu0 %v779_v13  ;;  %v819_v13 = vld [vmem:[#allocation6 + $0x20] sm:$0xff]  }
  0x61   :  { %715 = vmatprep.subr.bf16.mxu0 %v937_v0  ;;  %358 = vmatpush1.bf16.msra.mxu1 %v800_v21 }
  0x62   :  { %359 = vmatprep.subr.bf16.mxu1 %v801_v22 }
  0x64   :  { %716 = vmatpush3.bf16.msra.mxu0 %v780_v15  ;;  %v821_v15 = vld [vmem:[#allocation6 + $0x30] sm:$0xff]  }
  0x65   :  { %717 = vmatprep.subr.bf16.mxu0 %v937_v0  ;;  %360 = vmatpush1.bf16.msra.mxu1 %v803_v23 }
  0x66   :  { %361 = vmatprep.subr.bf16.mxu1 %v804_v25 }
  0x68   :  { %718 = vmatpush3.bf16.msra.mxu0 %v781_v16  ;;  %v822_v16 = vld [vmem:[#allocation6 + $0x38] sm:$0xff]  }
  0x69   :  { %723 = vmatprep.subr.bf16.mxu0 %v937_v0  ;;  %362 = vmatpush1.bf16.msra.mxu1 %v806_v26 }
  0x6a   :  { %743 = vmatprep.subr.bf16.mxu1 %v937_v0 }
  0x6b   :  { %720 = vmatmul.mubr.bf16.vlgmr.msra.gmra.mrb[0].mxu0 %v782_v17  ;;  %v645_v17 = vld [vmem:[#allocation7 + $0x3] ss:$0 sm:$0xff] }
  0x6c   :  { %739 = vmatprep.mubr.msk.bf16.mxu0 %vm938_vm0, %v937_v0  ;;  %724 = vmatpush3.bf16.msra.mxu0 %v807_v27  ;;  %v654_v27 = vld [vmem:[#allocation7 + $0x4] ss:$0 sm:$0xff] }
  0x6d   :  { %725 = vmatprep.subr.bf16.mxu0 %v937_v0 }
  0x70   :  { %726 = vmatpush3.bf16.msra.mxu0 %v808_v28 }
  0x71   :  { %727 = vmatprep.subr.bf16.mxu0 %v937_v0 }
  0x74   :  { %728 = vmatpush3.bf16.msra.mxu0 %v809_v39 }
  0x75   :  { %729 = vmatprep.subr.bf16.mxu0 %v937_v0 }
  0x78   :  { %730 = vmatpush3.bf16.msra.mxu0 %v810_v40 }
  0x79   :  { %731 = vmatprep.subr.bf16.mxu0 %v937_v0 }
  0x7c   :  { %732 = vmatpush3.bf16.msra.mxu0 %v811_v41 }
  0x7d   :  { %733 = vmatprep.subr.bf16.mxu0 %v937_v0 }
  0x80   :  { %734 = vmatpush3.bf16.msra.mxu0 %v812_v42 }
  0x81   :  { %735 = vmatprep.subr.bf16.mxu0 %v937_v0 }
  0x84   :  { %736 = vmatpush3.bf16.msra.mxu0 %v813_v43 }
  0x85   :  { %737 = vmatprep.subr.bf16.mxu0 %v937_v0 }
  0x88   :  { %738 = vmatpush3.bf16.msra.mxu0 %v814_v44 }
 0x13e   :  { %v246_v30 = vpop.f32.mrb[0].mxu0 }
 0x13f   :  { %v247_v31 = vadd.f32 %v619_v29, %v246_v30  ;;  %v721_v32 = vpop.f32.mrb[1].mxu0 }
 0x140   :  { %v249_v33 = vpop.f32.mrb[2].mxu0 }
 0x141   :  { %v250_v34 = vadd.f32 %v619_v29, %v249_v33  ;;  %v722_v35 = vpop.f32.mrb[3].mxu0  ;;  %823 = vtanh.f32 %v247_v31 }
 0x143   :  { %825 = vtanh.f32 %v250_v34 }
 0x14b   :  { %v824_v36 = vpop.eup %823 }
 0x14d   :  { %v826_v37 = vpop.eup %825 }
 0x14e   :  { %v255_v38 = vpack.c.bf16 %v826_v37, %v824_v36 }
 0x150   :  { %380 = vmatmul.mubr.bf16.vlgmr.msra.gmra.mrb[0].mxu1 %v255_v38 }
 0x151   :  { %759 = vmatprep.mubr.msk.bf16.mxu1 %vm938_vm0, %v937_v0  ;;  %744 = vmatpush3.bf16.msra.mxu1 %v815_v45 }
 0x152   :  { %745 = vmatprep.subr.bf16.mxu1 %v937_v0 }
 0x155   :  { %746 = vmatpush3.bf16.msra.mxu1 %v816_v46 }
 0x156   :  { %747 = vmatprep.subr.bf16.mxu1 %v937_v0 }
 0x159   :  { %748 = vmatpush3.bf16.msra.mxu1 %v817_v47 }
 0x15a   :  { %749 = vmatprep.subr.bf16.mxu1 %v937_v0 }
 0x15d   :  { %750 = vmatpush3.bf16.msra.mxu1 %v818_v48 }
 0x15e   :  { %751 = vmatprep.subr.bf16.mxu1 %v937_v0 }
 0x161   :  { %752 = vmatpush3.bf16.msra.mxu1 %v819_v13 }
 0x162   :  { %753 = vmatprep.subr.bf16.mxu1 %v937_v0 }
 0x165   :  { %754 = vmatpush3.bf16.msra.mxu1 %v820_v14 }
 0x166   :  { %755 = vmatprep.subr.bf16.mxu1 %v937_v0 }
 0x169   :  { %756 = vmatpush3.bf16.msra.mxu1 %v821_v15 }
 0x16a   :  { %757 = vmatprep.subr.bf16.mxu1 %v937_v0 }
 0x16d   :  { %758 = vmatpush3.bf16.msra.mxu1 %v822_v16 }
 0x223   :  { %v381_v54 = vpop.f32.mrb[0].mxu1 }
 0x224   :  { %v383_v55 = vpop.f32.mrb[1].mxu1  ;;  %v382_v5 = vadd.f32 %v381_v54, %v260_v1 }
 0x225   :  { %v384_v56 = vadd.f32 %v383_v55, %v264_v53  ;;  %v385_v57 = vpop.f32.mrb[2].mxu1 }
 0x226   :  { %v387_v58 = vpop.f32.mrb[3].mxu1  ;;  %v386_v8 = vadd.f32 %v385_v57, %v260_v1 }
 0x227   :  { %v394_v59 = vmul.f32 1.442695, %v384_v56  ;;  %v388_v60 = vadd.f32 %v387_v58, %v264_v53 }
 0x229   :  { %827 = vpow2.f32 %v394_v59  ;;  %v396_v61 = vmul.f32 1.442695, %v388_v60 }
 0x22b   :  { %829 = vpow2.f32 %v396_v61 }
 0x233   :  { %v828_v4 = vpop.eup %827 }
 0x234   :  { %v398_v6 = vmul.f32 %v828_v4, %v669_v2 }
 0x235   :  { %v830_v7 = vpop.eup %829 }
 0x236   :  { %v399_v9 = vmul.f32 %v830_v7, %v670_v3  ;;  %v400_v10 = vadd.f32 %v398_v6, %v382_v5 }
 0x238   :  { %v401_v11 = vadd.f32 %v399_v9, %v386_v8  ;;  %402 = vst [vmem:[%s1116_s8] sm:$0xff] %v400_v10 }
 0x23a   :  { %403 = vst [vmem:[%s1116_s8 + $0x8] sm:$0xff] %v401_v11  ;;  %v404_v12 = vpack.c.bf16 %v401_v11, %v400_v10 }
 0x23c   :  { %740 = vmatmul.mubr.bf16.vlgmr.msra.gmra.mrb[4].mxu0 %v404_v12 }
 0x30f   :  { %v493_v18 = vpop.f32.mrb[4].mxu0 }
 0x310   :  { %v494_v19 = vadd.f32 %v645_v17, %v493_v18  ;;  %v741_v20 = vpop.f32.mrb[5].mxu0 }
 0x311   :  { %v496_v21 = vpop.f32.mrb[6].mxu0 }
 0x312   :  { %v497_v22 = vadd.f32 %v645_v17, %v496_v21  ;;  %v742_v23 = vpop.f32.mrb[7].mxu0  ;;  %831 = vtanh.f32 %v494_v19 }
 0x314   :  { %833 = vtanh.f32 %v497_v22 }
 0x31c   :  { %v832_v24 = vpop.eup %831 }
 0x31e   :  { %v834_v25 = vpop.eup %833 }
 0x31f   :  { %v502_v26 = vpack.c.bf16 %v834_v25, %v832_v24 }
 0x321   :  { %760 = vmatmul.mubr.bf16.vlgmr.msra.gmra.mrb[4].mxu1 %v502_v26 }
 0x3f4   :  { %v591_v28 = vpop.f32.mrb[4].mxu1 }
 0x3f5   :  { %v761_v29 = vpop.f32.mrb[5].mxu1  ;;  %v592_v31 = vadd.f32 %v654_v27, %v591_v28 }
 0x3f6   :  { %v594_v30 = vpop.f32.mrb[6].mxu1 }
 0x3f7   :  { %v595_v0 = vadd.f32 %v654_v27, %v594_v30  ;;  %v762_v32 = vpop.f32.mrb[7].mxu1 }
 0x3f9   :  { %v674_v33 = vpack.c.bf16 %v595_v0, %v592_v31 }
 0x3fb   :  { %675 = vst [vmem:[%s1115_s7] sm:$0xff] %v674_v33  }
 0x3fc   :  { %616 = vsyncpa [#allocation3], 1 }
 0x3fd   :  { %617 = vsyncpa [#allocation5], 1 }
 0x3fe   :  { %618 = vsyncpa [#allocation8], 1 }

// kernel: fwd.1
= control target key start
LH: loop header
LB: loop body
LE: loop exit
PB: predicated region body
PF: predicated region fallthrough
CT: control target
= control target key end

     0   :  { %14 = vsyncpa [#allocation3], 0  ;;  %s1108_s0 = inlined_call_operand.vmem [shape: bf16[16,128], index: 0, kind: input, shape index: {}]   ;;  %s1109_s1 = inlined_call_operand.vmem [shape: bf16[16,128], index: 1, kind: input, shape index: {}]   ;;  %s1110_s2 = inlined_call_operand.vmem [shape: bf16[128,128], index: 2, kind: input, shape index: {}]   ;;  %s1111_s3 = inlined_call_operand.hbm [shape: bf16[128,256], index: 3, kind: input, shape index: {}]   ;;  %s1112_s4 = inlined_call_operand.hbm [shape: bf16[128,128], index: 4, kind: input, shape index: {}]   ;;  %s1113_s5 = inlined_call_operand.hbm [shape: bf16[128,128], index: 5, kind: input, shape index: {}]   ;;  %s1114_s6 = inlined_call_operand.hbm [shape: f32[1,640], index: 6, kind: input, shape index: {}]   ;;  %s1115_s7 = inlined_call_operand.vmem [shape: bf16[16,128], index: 7, kind: output, shape index: {0}]   ;;  %s1116_s8 = inlined_call_operand.vmem [shape: f32[16,128], index: 8, kind: output, shape index: {1}]  }
   0x1   :  { %15 = vsyncpa [#allocation5], 0 }
   0x2   :  { %16 = vsyncpa [#allocation8], 0  ;;  %s929_s27 = smov [#allocation4]   ;;  %s835_s9 = scalar_lea.hbm %s1112_s4, 1024 }
   0x3   :  { %s40_s28 = sshll.u32 %s929_s27, 4  ;;  %p836_p0 = scmp.ne.s32.totalorder %s1112_s4, %s835_s9  ;;  %s41_s28 = int_to_ptr.vmem [resolvable:$true] %s40_s28 }
   0x4   :  { %p839_p1 = scmp.lt.u32.totalorder %s835_s9, %s1112_s4 }
   0x6   :  { %p841_p2 = pnand %p839_p1, %p836_p0 }
   0x8   :  { %844 = shalt.err (!%p841_p2)
}
   0x9   :  { %s845_s14 = scalar_lea.vmem %s41_s28, 1024  ;;  %p850_p4 = scmp.lt.s32.totalorder %s41_s28, %s41_s28 }
   0xa   :  { %p846_p3 = scmp.ne.s32.totalorder %s41_s28, %s845_s14  ;;  %p851_p5 = scmp.lt.s32.totalorder %s845_s14, %s845_s14 }
   0xc   :  { %p852_p6 = por %p851_p5, %p850_p4 }
   0xe   :  { %p853_p7 = pnand %p852_p6, %p846_p3 }
  0x10   :  { %856 = shalt.err (!%p853_p7)
}
  0x11   :  { %s930_s15 = smov 64   ;;  %s931_s16 = smov 4  }
  0x12   :  { %46 = dma.hbm_to_vmem [thread:$0]  %s1112_s4, 1024, %s41_s28, [#allocation5], %s930_s15, %s930_s15, %s931_s16  }
  0x13   :  { %s932_s19 = smov [#allocation2]   ;;  %s857_s23 = scalar_lea.hbm %s1111_s3, 2048 }
  0x14   :  { %s28_s20 = sshll.u32 %s932_s19, 4  ;;  %p858_p8 = scmp.ne.s32.totalorder %s1111_s3, %s857_s23  ;;  %s29_s20 = int_to_ptr.vmem [resolvable:$true] %s28_s20 }
  0x15   :  { %p861_p9 = scmp.lt.u32.totalorder %s857_s23, %s1111_s3 }
  0x17   :  { %p863_p10 = pnand %p861_p9, %p858_p8 }
  0x19   :  { %866 = shalt.err (!%p863_p10)
}
  0x1a   :  { %s867_s29 = scalar_lea.vmem %s29_s20, 2048  ;;  %p872_p12 = scmp.lt.s32.totalorder %s29_s20, %s29_s20 }
  0x1b   :  { %p868_p11 = scmp.ne.s32.totalorder %s29_s20, %s867_s29  ;;  %p873_p13 = scmp.lt.s32.totalorder %s867_s29, %s867_s29 }
  0x1d   :  { %p874_p0 = por %p873_p13, %p872_p12 }
  0x1f   :  { %p875_p1 = pnand %p874_p0, %p868_p11 }
  0x21   :  { %878 = shalt.err (!%p875_p1)
}
  0x22   :  { %s933_s4 = smov 128   ;;  %s934_s28 = smov 8  }
  0x23   :  { %34 = dma.hbm_to_vmem [thread:$0]  %s1111_s3, 2048, %s29_s20, [#allocation3], %s933_s4, %s933_s4, %s934_s28  }
  0x24   :  { %s935_s10 = smov [#allocation6]   ;;  %s936_s12 = smov [#allocation7]  }
  0x25   :  { %s52_s11 = sshll.u32 %s935_s10, 4  ;;  %s65_s13 = sshll.u32 %s936_s12, 4  ;;  %s53_s11 = int_to_ptr.vmem [resolvable:$true] %s52_s11  ;;  %s66_s13 = int_to_ptr.vmem [resolvable:$true] %s65_s13 }
  0x26   :  { %s879_s18 = scalar_lea.hbm %s1113_s5, 1024 }
  0x27   :  { %p880_p2 = scmp.ne.s32.totalorder %s1113_s5, %s879_s18  ;;  %p883_p3 = scmp.lt.u32.totalorder %s879_s18, %s1113_s5 }
  0x29   :  { %p885_p4 = pnand %p883_p3, %p880_p2 }
  0x2b   :  { %888 = shalt.err (!%p885_p4)
}
  0x2c   :  { %s889_s3 = scalar_lea.vmem %s53_s11, 1024  ;;  %p894_p6 = scmp.lt.s32.totalorder %s53_s11, %s53_s11 }
  0x2d   :  { %p890_p5 = scmp.ne.s32.totalorder %s53_s11, %s889_s3  ;;  %p895_p7 = scmp.lt.s32.totalorder %s889_s3, %s889_s3 }
  0x2f   :  { %p896_p8 = por %p895_p7, %p894_p6 }
  0x31   :  { %p897_p9 = pnand %p896_p8, %p890_p5 }
  0x33   :  { %900 = shalt.err (!%p897_p9)
}
  0x34   :  { %58 = dma.hbm_to_vmem [thread:$0]  %s1113_s5, 1024, %s53_s11, [#allocation5], %s930_s15, %s930_s15, %s931_s16  }
  0x35   :  { %s901_s27 = scalar_lea.hbm %s1114_s6, 80 }
  0x36   :  { %p902_p10 = scmp.ne.s32.totalorder %s1114_s6, %s901_s27  ;;  %p905_p11 = scmp.lt.u32.totalorder %s901_s27, %s1114_s6 }
  0x38   :  { %p907_p12 = pnand %p905_p11, %p902_p10 }
  0x3a   :  { %910 = shalt.err (!%p907_p12)
}
  0x3b   :  { %s911_s9 = scalar_lea.vmem %s66_s13, 80  ;;  %s915_s10 = scalar_lea.vmem %s66_s13, 96 }
  0x3c   :  { %p912_p13 = scmp.ne.s32.totalorder %s66_s13, %s911_s9  ;;  %p916_p0 = scmp.lt.s32.totalorder %s66_s13, %s66_s13 }
  0x3d   :  { %p917_p1 = scmp.lt.s32.totalorder %s915_s10, %s911_s9 }
  0x3f   :  { %p918_p2 = por %p917_p1, %p916_p0 }
  0x41   :  { %p919_p3 = pnand %p918_p2, %p912_p13 }
  0x43   :  { %922 = shalt.err (!%p919_p3)
}
  0x44   :  { %68 = dma.hbm_to_vmem [thread:$0]  %s1114_s6, 80, %s66_s13, [#allocation8]  }
  0x45   :  { %923 = dma.done.wait [#allocation3], 2048  }
  0x46   :  { %924 = vsyncadd [#allocation3], 4294965248 }
  0x47   :  { %925 = dma.done.wait [#allocation5], 2048  }
  0x48   :  { %926 = vsyncadd [#allocation5], 4294965248 }
  0x49   :  { %927 = dma.done.wait [#allocation8], 80  }
  0x4a   :  { %928 = vsyncadd [#allocation8], 4294967216  ;;  %v937_v0 = vmov 0.0   ;;  %vm938_vm0 = vmmov 0   ;;  %v774_v1 = vld [vmem:[%s1110_s2] sm:$0xff]   ;;  %v775_v2 = vld [vmem:[%s1110_s2 + $0x8] sm:$0xff]   ;;  %v257_v49 = vlaneseq }
  0x4b   :  { %703 = vmatprep.subr.bf16.mxu0 %v937_v0  ;;  %719 = vmatprep.mubr.msk.bf16.mxu0 %vm938_vm0, %v937_v0  ;;  %v776_v3 = vld [vmem:[%s1110_s2 + $0x10] sm:$0xff]   ;;  %v777_v4 = vld [vmem:[%s1110_s2 + $0x18] sm:$0xff]   ;;  %v783_v5 = vld [vmem:[#allocation2 + $0x4] ss:$8 sps:$4 sm:$0xff]   ;;  %v939_v24 = vmov 0  }
  0x4c   :  { %704 = vmatpush3.bf16.msra.mxu0 %v774_v1  ;;  %v785_v6 = vld [vmem:[#allocation2] ss:$8 sps:$4 sm:$0xff]   ;;  %347 = vmatprep.subr.bf16.mxu1 %v783_v5  ;;  %v786_v7 = vld [vmem:[#allocation2 + $0x14] ss:$8 sps:$4 sm:$0xff]   ;;  %v788_v8 = vld [vmem:[#allocation2 + $0x10] ss:$8 sps:$4 sm:$0xff]  }
  0x4d   :  { %705 = vmatprep.subr.bf16.mxu0 %v937_v0  ;;  %348 = vmatpush1.bf16.msra.mxu1 %v785_v6  ;;  %v789_v9 = vld [vmem:[#allocation2 + $0x24] ss:$8 sps:$4 sm:$0xff]   ;;  %v791_v11 = vld [vmem:[#allocation2 + $0x20] ss:$8 sps:$4 sm:$0xff]   ;;  %v792_v12 = vld [vmem:[#allocation2 + $0x34] ss:$8 sps:$4 sm:$0xff]  }
  0x4e   :  { %349 = vmatprep.subr.bf16.mxu1 %v786_v7  ;;  %v778_v10 = vld [vmem:[%s1110_s2 + $0x20] sm:$0xff]   ;;  %v779_v13 = vld [vmem:[%s1110_s2 + $0x28] sm:$0xff]   ;;  %v794_v14 = vld [vmem:[#allocation2 + $0x30] ss:$8 sps:$4 sm:$0xff]   ;;  %379 = vmatprep.mubr.bf16.mxu1 %v939_v24  ;;  %v258_v50 = vshrl.u32 %v257_v49, 7 }
  0x4f   :  { %v780_v15 = vld [vmem:[%s1110_s2 + $0x30] sm:$0xff]   ;;  %v781_v16 = vld [vmem:[%s1110_s2 + $0x38] sm:$0xff]   ;;  %v782_v17 = vld [vmem:[%s1108_s0] sm:$0xff]  }
  0x50   :  { %706 = vmatpush3.bf16.msra.mxu0 %v775_v2  ;;  %v795_v18 = vld [vmem:[#allocation2 + $0x44] ss:$8 sps:$4 sm:$0xff]   ;;  %v797_v19 = vld [vmem:[#allocation2 + $0x40] ss:$8 sps:$4 sm:$0xff]   ;;  %v798_v20 = vld [vmem:[#allocation2 + $0x54] ss:$8 sps:$4 sm:$0xff]  }
  0x51   :  { %707 = vmatprep.subr.bf16.mxu0 %v937_v0  ;;  %350 = vmatpush1.bf16.msra.mxu1 %v788_v8  ;;  %v800_v21 = vld [vmem:[#allocation2 + $0x50] ss:$8 sps:$4 sm:$0xff]   ;;  %v801_v22 = vld [vmem:[#allocation2 + $0x64] ss:$8 sps:$4 sm:$0xff]   ;;  %v803_v23 = vld [vmem:[#allocation2 + $0x60] ss:$8 sps:$4 sm:$0xff]  }
  0x52   :  { %351 = vmatprep.subr.bf16.mxu1 %v789_v9  ;;  %v804_v25 = vld [vmem:[#allocation2 + $0x74] ss:$8 sps:$4 sm:$0xff]   ;;  %v806_v26 = vld [vmem:[#allocation2 + $0x70] ss:$8 sps:$4 sm:$0xff]   ;;  %v807_v27 = vld [vmem:[#allocation4] sm:$0xff]   ;;  %v263_v51 = vsub.s32 1, %v258_v50 }
  0x53   :  { %v808_v28 = vld [vmem:[#allocation4 + $0x8] sm:$0xff]   ;;  %v619_v29 = vld [vmem:[#allocation7] ss:$0 sm:$0xff]  ;;  %v809_v39 = vld [vmem:[#allocation4 + $0x10] sm:$0xff]   ;;  %v259_v62 = vsub.s32 0, %v258_v50 }
  0x54   :  { %708 = vmatpush3.bf16.msra.mxu0 %v776_v3  ;;  %v810_v40 = vld [vmem:[#allocation4 + $0x18] sm:$0xff]   ;;  %v811_v41 = vld [vmem:[#allocation4 + $0x20] sm:$0xff]   ;;  %v812_v42 = vld [vmem:[#allocation4 + $0x28] sm:$0xff]  }
  0x55   :  { %709 = vmatprep.subr.bf16.mxu0 %v937_v0  ;;  %352 = vmatpush1.bf16.msra.mxu1 %v791_v11  ;;  %v813_v43 = vld [vmem:[#allocation4 + $0x30] sm:$0xff]   ;;  %v814_v44 = vld [vmem:[#allocation4 + $0x38] sm:$0xff]   ;;  %v815_v45 = vld [vmem:[#allocation6] sm:$0xff]  }
  0x56   :  { %353 = vmatprep.subr.bf16.mxu1 %v792_v12  ;;  %v816_v46 = vld [vmem:[#allocation6 + $0x8] sm:$0xff]   ;;  %v817_v47 = vld [vmem:[#allocation6 + $0x10] sm:$0xff]   ;;  %v818_v48 = vld [vmem:[#allocation6 + $0x18] sm:$0xff]  }
  0x57   :  { %v83_v52 = vld [vmem:[#allocation7 + $0x1] sm:$0x3] }
  0x58   :  { %710 = vmatpush3.bf16.msra.mxu0 %v777_v4  ;;  %v264_v53 = vrot.slane %v83_v52, %v263_v51  ;;  %v668_v63 = vld [vmem:[%s1109_s1] sm:$0xff]   ;;  %v260_v1 = vrot.slane %v83_v52, %v259_v62 }
  0x59   :  { %711 = vmatprep.subr.bf16.mxu0 %v937_v0  ;;  %354 = vmatpush1.bf16.msra.mxu1 %v794_v14  ;;  %v669_v2 = vunpack.c.l.bf16 %v668_v63  ;;  %v670_v3 = vunpack.c.h.bf16 %v668_v63  ;;  %v820_v14 = vld [vmem:[#allocation6 + $0x28] sm:$0xff]  }
  0x5a   :  { %355 = vmatprep.subr.bf16.mxu1 %v795_v18 }
  0x5c   :  { %712 = vmatpush3.bf16.msra.mxu0 %v778_v10 }
  0x5d   :  { %713 = vmatprep.subr.bf16.mxu0 %v937_v0  ;;  %356 = vmatpush1.bf16.msra.mxu1 %v797_v19 }
  0x5e   :  { %357 = vmatprep.subr.bf16.mxu1 %v798_v20 }
  0x60   :  { %714 = vmatpush3.bf16.msra.mxu0 %v779_v13  ;;  %v819_v13 = vld [vmem:[#allocation6 + $0x20] sm:$0xff]  }
  0x61   :  { %715 = vmatprep.subr.bf16.mxu0 %v937_v0  ;;  %358 = vmatpush1.bf16.msra.mxu1 %v800_v21 }
  0x62   :  { %359 = vmatprep.subr.bf16.mxu1 %v801_v22 }
  0x64   :  { %716 = vmatpush3.bf16.msra.mxu0 %v780_v15  ;;  %v821_v15 = vld [vmem:[#allocation6 + $0x30] sm:$0xff]  }
  0x65   :  { %717 = vmatprep.subr.bf16.mxu0 %v937_v0  ;;  %360 = vmatpush1.bf16.msra.mxu1 %v803_v23 }
  0x66   :  { %361 = vmatprep.subr.bf16.mxu1 %v804_v25 }
  0x68   :  { %718 = vmatpush3.bf16.msra.mxu0 %v781_v16  ;;  %v822_v16 = vld [vmem:[#allocation6 + $0x38] sm:$0xff]  }
  0x69   :  { %723 = vmatprep.subr.bf16.mxu0 %v937_v0  ;;  %362 = vmatpush1.bf16.msra.mxu1 %v806_v26 }
  0x6a   :  { %743 = vmatprep.subr.bf16.mxu1 %v937_v0 }
  0x6b   :  { %720 = vmatmul.mubr.bf16.vlgmr.msra.gmra.mrb[0].mxu0 %v782_v17  ;;  %v645_v17 = vld [vmem:[#allocation7 + $0x3] ss:$0 sm:$0xff] }
  0x6c   :  { %739 = vmatprep.mubr.msk.bf16.mxu0 %vm938_vm0, %v937_v0  ;;  %724 = vmatpush3.bf16.msra.mxu0 %v807_v27  ;;  %v654_v27 = vld [vmem:[#allocation7 + $0x4] ss:$0 sm:$0xff] }
  0x6d   :  { %725 = vmatprep.subr.bf16.mxu0 %v937_v0 }
  0x70   :  { %726 = vmatpush3.bf16.msra.mxu0 %v808_v28 }
  0x71   :  { %727 = vmatprep.subr.bf16.mxu0 %v937_v0 }
  0x74   :  { %728 = vmatpush3.bf16.msra.mxu0 %v809_v39 }
  0x75   :  { %729 = vmatprep.subr.bf16.mxu0 %v937_v0 }
  0x78   :  { %730 = vmatpush3.bf16.msra.mxu0 %v810_v40 }
  0x79   :  { %731 = vmatprep.subr.bf16.mxu0 %v937_v0 }
  0x7c   :  { %732 = vmatpush3.bf16.msra.mxu0 %v811_v41 }
  0x7d   :  { %733 = vmatprep.subr.bf16.mxu0 %v937_v0 }
  0x80   :  { %734 = vmatpush3.bf16.msra.mxu0 %v812_v42 }
  0x81   :  { %735 = vmatprep.subr.bf16.mxu0 %v937_v0 }
  0x84   :  { %736 = vmatpush3.bf16.msra.mxu0 %v813_v43 }
  0x85   :  { %737 = vmatprep.subr.bf16.mxu0 %v937_v0 }
  0x88   :  { %738 = vmatpush3.bf16.msra.mxu0 %v814_v44 }
 0x13e   :  { %v246_v30 = vpop.f32.mrb[0].mxu0 }
 0x13f   :  { %v247_v31 = vadd.f32 %v619_v29, %v246_v30  ;;  %v721_v32 = vpop.f32.mrb[1].mxu0 }
 0x140   :  { %v249_v33 = vpop.f32.mrb[2].mxu0 }
 0x141   :  { %v250_v34 = vadd.f32 %v619_v29, %v249_v33  ;;  %v722_v35 = vpop.f32.mrb[3].mxu0  ;;  %823 = vtanh.f32 %v247_v31 }
 0x143   :  { %825 = vtanh.f32 %v250_v34 }
 0x14b   :  { %v824_v36 = vpop.eup %823 }
 0x14d   :  { %v826_v37 = vpop.eup %825 }
 0x14e   :  { %v255_v38 = vpack.c.bf16 %v826_v37, %v824_v36 }
 0x150   :  { %380 = vmatmul.mubr.bf16.vlgmr.msra.gmra.mrb[0].mxu1 %v255_v38 }
 0x151   :  { %759 = vmatprep.mubr.msk.bf16.mxu1 %vm938_vm0, %v937_v0  ;;  %744 = vmatpush3.bf16.msra.mxu1 %v815_v45 }
 0x152   :  { %745 = vmatprep.subr.bf16.mxu1 %v937_v0 }
 0x155   :  { %746 = vmatpush3.bf16.msra.mxu1 %v816_v46 }
 0x156   :  { %747 = vmatprep.subr.bf16.mxu1 %v937_v0 }
 0x159   :  { %748 = vmatpush3.bf16.msra.mxu1 %v817_v47 }
 0x15a   :  { %749 = vmatprep.subr.bf16.mxu1 %v937_v0 }
 0x15d   :  { %750 = vmatpush3.bf16.msra.mxu1 %v818_v48 }
 0x15e   :  { %751 = vmatprep.subr.bf16.mxu1 %v937_v0 }
 0x161   :  { %752 = vmatpush3.bf16.msra.mxu1 %v819_v13 }
 0x162   :  { %753 = vmatprep.subr.bf16.mxu1 %v937_v0 }
 0x165   :  { %754 = vmatpush3.bf16.msra.mxu1 %v820_v14 }
 0x166   :  { %755 = vmatprep.subr.bf16.mxu1 %v937_v0 }
 0x169   :  { %756 = vmatpush3.bf16.msra.mxu1 %v821_v15 }
 0x16a   :  { %757 = vmatprep.subr.bf16.mxu1 %v937_v0 }
 0x16d   :  { %758 = vmatpush3.bf16.msra.mxu1 %v822_v16 }
 0x223   :  { %v381_v54 = vpop.f32.mrb[0].mxu1 }
 0x224   :  { %v383_v55 = vpop.f32.mrb[1].mxu1  ;;  %v382_v5 = vadd.f32 %v381_v54, %v260_v1 }
 0x225   :  { %v384_v56 = vadd.f32 %v383_v55, %v264_v53  ;;  %v385_v57 = vpop.f32.mrb[2].mxu1 }
 0x226   :  { %v387_v58 = vpop.f32.mrb[3].mxu1  ;;  %v386_v8 = vadd.f32 %v385_v57, %v260_v1 }
 0x227   :  { %v394_v59 = vmul.f32 1.442695, %v384_v56  ;;  %v388_v60 = vadd.f32 %v387_v58, %v264_v53 }
 0x229   :  { %827 = vpow2.f32 %v394_v59  ;;  %v396_v61 = vmul.f32 1.442695, %v388_v60 }
 0x22b   :  { %829 = vpow2.f32 %v396_v61 }
 0x233   :  { %v828_v4 = vpop.eup %827 }
 0x234   :  { %v398_v6 = vmul.f32 %v828_v4, %v669_v2 }
 0x235   :  { %v830_v7 = vpop.eup %829 }
 0x236   :  { %v399_v9 = vmul.f32 %v830_v7, %v670_v3  ;;  %v400_v10 = vadd.f32 %v398_v6, %v382_v5 }
 0x238   :  { %v401_v11 = vadd.f32 %v399_v9, %v386_v8  ;;  %402 = vst [vmem:[%s1116_s8] sm:$0xff] %v400_v10 }
 0x23a   :  { %403 = vst [vmem:[%s1116_s8 + $0x8] sm:$0xff] %v401_v11  ;;  %v404_v12 = vpack.c.bf16 %v401_v11, %v400_v10 }
 0x23c   :  { %740 = vmatmul.mubr.bf16.vlgmr.msra.gmra.mrb[4].mxu0 %v404_v12 }
 0x30f   :  { %v493_v18 = vpop.f32.mrb[4].mxu0 }
 0x310   :  { %v494_v19 = vadd.f32 %v645_v17, %v493_v18  ;;  %v741_v20 = vpop.f32.mrb[5].mxu0 }
 0x311   :  { %v496_v21 = vpop.f32.mrb[6].mxu0 }
 0x312   :  { %v497_v22 = vadd.f32 %v645_v17, %v496_v21  ;;  %v742_v23 = vpop.f32.mrb[7].mxu0  ;;  %831 = vtanh.f32 %v494_v19 }
 0x314   :  { %833 = vtanh.f32 %v497_v22 }
 0x31c   :  { %v832_v24 = vpop.eup %831 }
 0x31e   :  { %v834_v25 = vpop.eup %833 }
 0x31f   :  { %v502_v26 = vpack.c.bf16 %v834_v25, %v832_v24 }
 0x321   :  { %760 = vmatmul.mubr.bf16.vlgmr.msra.gmra.mrb[4].mxu1 %v502_v26 }
 0x3f4   :  { %v591_v28 = vpop.f32.mrb[4].mxu1 }
 0x3f5   :  { %v761_v29 = vpop.f32.mrb[5].mxu1  ;;  %v592_v31 = vadd.f32 %v654_v27, %v591_v28 }
 0x3f6   :  { %v594_v30 = vpop.f32.mrb[6].mxu1 }
 0x3f7   :  { %v595_v0 = vadd.f32 %v654_v27, %v594_v30  ;;  %v762_v32 = vpop.f32.mrb[7].mxu1 }
 0x3f9   :  { %v674_v33 = vpack.c.bf16 %v595_v0, %v592_v31 }
 0x3fb   :  { %675 = vst [vmem:[%s1115_s7] sm:$0xff] %v674_v33  }
 0x3fc   :  { %616 = vsyncpa [#allocation3], 1 }
 0x3fd   :  { %617 = vsyncpa [#allocation5], 1 }
 0x3fe   :  { %618 = vsyncpa [#allocation8], 1 }

</bundles_post_ra>
